<compile_context>
chip_gen: v7x
topology: tpu7x:2x2x1
jax: 0.10.0
libtpu: 0.0.40
codegen_flags: <defaults>
</compile_context>

<pallas_src>
import numbers

import jax
import jax.numpy as jnp
from jax.experimental import pallas as pl
from jax.experimental.pallas import tpu as pltpu

# Grayscale weights used by torchvision rgb_to_grayscale.
_GW_R, _GW_G, _GW_B = 0.2989, 0.587, 0.114

_LANE = 128            # lanes per vreg row (fast axis)
_SUB = 8               # sublane granularity
_MAX_ROW_TILE = 2048   # 3*2048*128*4 B = 3 MiB per block (12 MiB double-buffered io)
_EPS = 1e-12           # reciprocal guard: keeps approx recip finite for gray/black


def _cdiv(a, b):
    return -(-a // b)


def _round_up(a, b):
    return _cdiv(a, b) * b


def _check_input(value, name, center=1.0, bound=(0.0, float("inf")),
                 clip_first_on_zero=True):
    """Same semantics as ColorJitter._check_input (returns None if no-op)."""
    if isinstance(value, numbers.Number):
        if value < 0:
            raise ValueError(f"If {name} is a single number, it must be non negative.")
        value = [center - float(value), center + float(value)]
        if clip_first_on_zero:
            value[0] = max(value[0], 0.0)
    elif isinstance(value, (tuple, list)) and len(value) == 2:
        if not bound[0] <= value[0] <= value[1] <= bound[1]:
            raise ValueError(f"{name} values should be between {bound}")
    else:
        raise TypeError(f"{name} should be a single number or a list/tuple of length 2.")
    if value[0] == value[1] == center:
        value = None
    return value


def _color_jitter_kernel(fac_ref, mean_ref, x_ref, o_ref):
    # fac_ref  : SMEM (4,) f32 (scalar prefetch) -> [brightness, contrast, sat, hue]
    # mean_ref : SMEM (N,) f32 (scalar prefetch) -> per-image grayscale mean of
    #                                               the brightness-adjusted image
    # x_ref    : VMEM (1, 3, row_tile, 128)
    # o_ref    : VMEM (1, 3, row_tile, 128)
    dt = x_ref.dtype
    bf = fac_ref[0]
    cf = fac_ref[1]
    sf = fac_ref[2]
    hf = fac_ref[3]
    mean = mean_ref[pl.program_id(0)]

    # Scalar precomputation in f32 on the scalar unit, then a single cast to the
    # vector compute dtype (so a bf16 image stays bf16 through the whole chain).
    c_off = (1.0 - cf) * mean          # contrast blend offset
    one_m_sf = 1.0 - sf                # saturation blend weight
    h_shift = 6.0 * hf + 6.0           # fused hue shift, in sextant units

    bf = bf.astype(dt)
    cf = cf.astype(dt)
    sf = sf.astype(dt)
    c_off = c_off.astype(dt)
    one_m_sf = one_m_sf.astype(dt)
    h_shift = h_shift.astype(dt)

    r = x_ref[0, 0, :, :]
    g = x_ref[0, 1, :, :]
    b = x_ref[0, 2, :, :]

    # ---- 1) brightness: blend(img, 0, bf) = clip(img * bf, 0, 1) -------------
    r = jnp.clip(r * bf, 0.0, 1.0)
    g = jnp.clip(g * bf, 0.0, 1.0)
    b = jnp.clip(b * bf, 0.0, 1.0)

    # ---- 2) contrast: blend(img, mean(grayscale(img)), cf) -------------------
    r = jnp.clip(cf * r + c_off, 0.0, 1.0)
    g = jnp.clip(cf * g + c_off, 0.0, 1.0)
    b = jnp.clip(cf * b + c_off, 0.0, 1.0)

    # ---- 3) saturation: blend(img, grayscale(img), sf) -----------------------
    gray = _GW_R * r + _GW_G * g + _GW_B * b
    r = jnp.clip(sf * r + one_m_sf * gray, 0.0, 1.0)
    g = jnp.clip(sf * g + one_m_sf * gray, 0.0, 1.0)
    b = jnp.clip(sf * b + one_m_sf * gray, 0.0, 1.0)

    # ---- 4) hue: RGB -> HSV, h += hf (mod 1), HSV -> RGB ----------------------
    maxc = jnp.maximum(jnp.maximum(r, g), b)
    minc = jnp.minimum(jnp.minimum(r, g), b)
    cr = maxc - minc
    # max(x, eps) (instead of an == mask) keeps the EUP approx reciprocals
    # finite for gray (cr == 0) and black (maxc == 0) pixels; the numerators
    # are then exactly 0, so hue/saturation come out 0 -- no inf/NaN possible.
    inv_maxc = pl.reciprocal(jnp.maximum(maxc, _EPS), approx=True)
    inv_cr = pl.reciprocal(jnp.maximum(cr, _EPS), approx=True)
    s = jnp.minimum(cr * inv_maxc, 1.0)   # clamp guards approx-recip overshoot
    rc = (maxc - r) * inv_cr
    gc = (maxc - g) * inv_cr
    bc = (maxc - b) * inv_cr
    # Raw hue in sextant units via a 2-deep nested select (no boolean combines,
    # retires rc/gc/bc early to lower vreg pressure -> fewer spills on v5e).
    h_raw = jnp.where(maxc == r, bc - gc,
                      jnp.where(maxc == g, 2.0 + rc - bc, 4.0 + gc - rc))
    v = maxc

    # Fused hue wrap.  torchvision does
    #   h = fmod(h_raw/6 + 1, 1); h = (h + hf) % 1; i = floor(6h); f = 6h - i
    # which equals (h_raw + 6*hf + 6) mod 6 in sextant units.  h_raw is in
    # ~[-1, 5] and 6*hf + 6 in [3, 9], so the argument lies in ~[2, 14] and the
    # mod reduces to one range-selected subtraction (exact; result in [0, 6)).
    hx = h_raw + h_shift
    h6 = hx - jnp.where(hx >= 6.0, jnp.where(hx >= 12.0, 12.0, 6.0), 0.0)
    i = jnp.floor(h6)                      # in {0, ..., 5}
    f = h6 - i

    # s, v, f are all in [0, 1], so p/q/t need no clips.
    p = v * (1.0 - s)
    q = v * (1.0 - s * f)
    t = v * (1.0 - s * (1.0 - f))

    # Hoist sextant compares once; reused by all three output channels.
    i0 = i == 0.0
    i1 = i == 1.0
    i2 = i == 2.0
    i3 = i == 3.0
    i4 = i == 4.0

    def sel(c0, c1, c2, c3, c4, c5):
        out = jnp.where(i0, c0, c5)
        out = jnp.where(i1, c1, out)
        out = jnp.where(i2, c2, out)
        out = jnp.where(i3, c3, out)
        return jnp.where(i4, c4, out)

    # Store each channel as soon as it is computed (keeps live ranges short).
    o_ref[0, 0, :, :] = sel(v, q, p, p, t, v)
    o_ref[0, 1, :, :] = sel(t, v, v, q, p, p)
    o_ref[0, 2, :, :] = sel(p, p, t, v, v, q)


def color_jitter_forward(image, mask, factors, compute_dtype=None):
    """image: (N, 3, H, W) float in [0,1]; mask passed through unchanged.

    factors: (4,) f32 = [brightness_factor, contrast_factor,
                         saturation_factor, hue_factor]
    compute_dtype: optional (e.g. jnp.bfloat16 on v6e/v7x) -- casts once and
                   runs the whole elementwise chain + IO in that dtype.
    """
    N, C, H, W = image.shape
    assert C == 3, "ColorJitter expects RGB images (C == 3)"
    factors = factors.astype(jnp.float32)
    if compute_dtype is not None:
        image = image.astype(compute_dtype)
    dtype = image.dtype

    # Per-image grayscale mean of the brightness-adjusted image (needed by the
    # contrast blend).  Hoisted out of the kernel (tiny jnp reduction) so the
    # main kernel can tile the spatial axis freely.
    bf = factors[0]
    img_b = jnp.clip(image.astype(jnp.float32) * bf, 0.0, 1.0)
    gray = _GW_R * img_b[:, 0] + _GW_G * img_b[:, 1] + _GW_B * img_b[:, 2]
    means = jnp.mean(gray, axis=(1, 2)).astype(jnp.float32)          # (N,)

    # Lane-dense view: (N, 3, H, W) -> (N, 3, rows, 128).
    HW = H * W
    rows = _cdiv(HW, _LANE)
    hw_pad = rows * _LANE
    x = image.reshape(N, 3, HW)
    if hw_pad != HW:
        # Slow path only when H*W is not a multiple of 128 (pad + crop cost two
        # extra HBM passes).  Common sizes (224^2, 256^2, 512^2, ...) skip this.
        x = jnp.pad(x, ((0, 0), (0, 0), (0, hw_pad - HW)))
    x = x.reshape(N, 3, rows, _LANE)

    # Row tiling.  A single tile uses the full row extent (no sublane padding
    # required); multi-tile cases (rows > _MAX_ROW_TILE, or N == 1 where we
    # want >= 2 parallel blocks for v7x's two TensorCores) use a multiple-of-8
    # tile and rely on Pallas edge-block masking for the last partial block, so
    # row padding is never materialised in HBM.
    min_tiles = 2 if (N == 1 and rows > _SUB) else 1
    num_tiles = max(_cdiv(rows, _MAX_ROW_TILE), min_tiles)
    if num_tiles == 1:
        row_tile = rows
    else:
        row_tile = _round_up(_cdiv(rows, num_tiles), _SUB)
        num_tiles = _cdiv(rows, row_tile)

    itemsize = jnp.dtype(dtype).itemsize
    cost = pl.CostEstimate(
        flops=80 * N * 3 * H * W,
        transcendentals=2 * N * H * W,              # two approx reciprocals / pixel
        bytes_accessed=2 * itemsize * N * 3 * H * W,
    )

    out = pl.pallas_call(
        _color_jitter_kernel,
        out_shape=jax.ShapeDtypeStruct((N, 3, rows, _LANE), dtype),
        grid_spec=pltpu.PrefetchScalarGridSpec(
            num_scalar_prefetch=2,                  # factors, means -> SMEM once
            grid=(N, num_tiles),
            in_specs=[
                pl.BlockSpec((1, 3, row_tile, _LANE),
                             lambda n, t, fac, mean: (n, 0, t, 0)),
            ],
            out_specs=pl.BlockSpec((1, 3, row_tile, _LANE),
                                   lambda n, t, fac, mean: (n, 0, t, 0)),
        ),
        compiler_params=pltpu.CompilerParams(
            dimension_semantics=("parallel", "parallel"),
            vmem_limit_bytes=32 << 20),
        cost_estimate=cost,
    )(factors, means, x)

    out = out.reshape(N, 3, hw_pad)
    if hw_pad != HW:
        out = out[:, :, :HW]
    out = out.reshape(N, 3, H, W)
    return out, mask


def sample_factors(key, brightness=0.4, contrast=0.4, saturation=0.4, hue=0.1):
    """Deterministically sample the four jitter factors (like __init__ + forward)."""
    b_rng = _check_input(brightness, "brightness")
    c_rng = _check_input(contrast, "contrast")
    s_rng = _check_input(saturation, "saturation")
    h_rng = _check_input(hue, "hue", center=0.0, bound=(-0.5, 0.5),
                         clip_first_on_zero=False)

    keys = jax.random.split(key, 4)

    def draw(k, rng, identity):
        if rng is None:
            return jnp.float32(identity)
        return jax.random.uniform(k, (), jnp.float32,
                                  minval=rng[0], maxval=rng[1])

    bf = draw(keys[0], b_rng, 1.0)
    cf = draw(keys[1], c_rng, 1.0)
    sf = draw(keys[2], s_rng, 1.0)
    hf = draw(keys[3], h_rng, 0.0)
    return jnp.stack([bf, cf, sf, hf]).astype(jnp.float32)


if __name__ == "__main__":
    key = jax.random.PRNGKey(0)
    k_img, k_mask, k_fac = jax.random.split(key, 3)

    N, C, H, W = 2, 3, 16, 16
    image = jax.random.uniform(k_img, (N, C, H, W), jnp.float32)      # [0, 1]
    mask = (jax.random.uniform(k_mask, (N, 1, H, W)) > 0.5).astype(jnp.float32)

    factors = sample_factors(k_fac)

    out_image, out_mask = color_jitter_forward(image, mask, factors)
    jax.block_until_ready(out_image)
    jax.block_until_ready(out_mask)

    assert out_image.shape == image.shape and out_image.dtype == image.dtype
    assert out_mask.shape == mask.shape
    assert bool(jnp.all(jnp.isfinite(out_image)))
    assert bool(jnp.all((out_image >= 0.0) & (out_image <= 1.0)))

    print("KERNEL_OK")
</pallas_src>

<mosaic_0001>
module attributes {stable_mosaic.version = 11 : i64} {
  func.func @_color_jitter_kernel(%arg0: i32, %arg1: i32, %arg2: memref<4xf32, #tpu.memory_space<smem>>, %arg3: memref<2xf32, #tpu.memory_space<smem>>, %arg4: memref<1x3x2x128xf32, #tpu.memory_space<vmem>>, %arg5: memref<1x3x2x128xf32, #tpu.memory_space<vmem>>) attributes {dimension_semantics = [#tpu.dimension_semantics<parallel>, #tpu.dimension_semantics<parallel>], iteration_bounds = array<i64: 2, 1>, scalar_prefetch = 2 : i64, scratch_operands = 0 : i64, tpu.core_type = #tpu.core_type<tc>, window_params = [{transform_indices = @transform_0, window_bounds = array<i64: 1, 3, 2, 128>}, {transform_indices = @transform_1, window_bounds = array<i64: 1, 3, 2, 128>}]} {
    %c0 = arith.constant 0 : index
    %0 = memref.load %arg2[%c0] : memref<4xf32, #tpu.memory_space<smem>>
    %c1 = arith.constant 1 : index
    %1 = memref.load %arg2[%c1] : memref<4xf32, #tpu.memory_space<smem>>
    %c2 = arith.constant 2 : index
    %2 = memref.load %arg2[%c2] : memref<4xf32, #tpu.memory_space<smem>>
    %c3 = arith.constant 3 : index
    %3 = memref.load %arg2[%c3] : memref<4xf32, #tpu.memory_space<smem>>
    %4 = arith.index_cast %arg0 : i32 to index
    %5 = memref.load %arg3[%4] : memref<2xf32, #tpu.memory_space<smem>>
    %cst = arith.constant 1.000000e+00 : f32
    %6 = arith.subf %cst, %1 : f32
    %7 = arith.mulf %6, %5 : f32
    %cst_0 = arith.constant 1.000000e+00 : f32
    %8 = arith.subf %cst_0, %2 : f32
    %cst_1 = arith.constant 6.000000e+00 : f32
    %9 = arith.mulf %cst_1, %3 : f32
    %cst_2 = arith.constant 6.000000e+00 : f32
    %10 = arith.addf %9, %cst_2 : f32
    %c0_3 = arith.constant 0 : index
    %c0_4 = arith.constant 0 : index
    %c0_5 = arith.constant 0 : index
    %c0_6 = arith.constant 0 : index
    %11 = vector.load %arg4[%c0_3, %c0_4, %c0_5, %c0_6] : memref<1x3x2x128xf32, #tpu.memory_space<vmem>>, vector<1x1x2x128xf32>
    %12 = vector.shape_cast %11 : vector<1x1x2x128xf32> to vector<2x128xf32>
    %c0_7 = arith.constant 0 : index
    %c1_8 = arith.constant 1 : index
    %c0_9 = arith.constant 0 : index
    %c0_10 = arith.constant 0 : index
    %13 = vector.load %arg4[%c0_7, %c1_8, %c0_9, %c0_10] : memref<1x3x2x128xf32, #tpu.memory_space<vmem>>, vector<1x1x2x128xf32>
    %14 = vector.shape_cast %13 : vector<1x1x2x128xf32> to vector<2x128xf32>
    %c0_11 = arith.constant 0 : index
    %c2_12 = arith.constant 2 : index
    %c0_13 = arith.constant 0 : index
    %c0_14 = arith.constant 0 : index
    %15 = vector.load %arg4[%c0_11, %c2_12, %c0_13, %c0_14] : memref<1x3x2x128xf32, #tpu.memory_space<vmem>>, vector<1x1x2x128xf32>
    %16 = vector.shape_cast %15 : vector<1x1x2x128xf32> to vector<2x128xf32>
    %17 = vector.broadcast %0 : f32 to vector<2x128xf32>
    %18 = arith.mulf %12, %17 : vector<2x128xf32>
    %cst_15 = arith.constant 0.000000e+00 : f32
    %cst_16 = arith.constant 1.000000e+00 : f32
    %19 = vector.broadcast %cst_15 : f32 to vector<2x128xf32>
    %20 = arith.maximumf %19, %18 : vector<2x128xf32>
    %21 = vector.broadcast %cst_16 : f32 to vector<2x128xf32>
    %22 = arith.minimumf %21, %20 : vector<2x128xf32>
    %23 = vector.broadcast %0 : f32 to vector<2x128xf32>
    %24 = arith.mulf %14, %23 : vector<2x128xf32>
    %cst_17 = arith.constant 0.000000e+00 : f32
    %cst_18 = arith.constant 1.000000e+00 : f32
    %25 = vector.broadcast %cst_17 : f32 to vector<2x128xf32>
    %26 = arith.maximumf %25, %24 : vector<2x128xf32>
    %27 = vector.broadcast %cst_18 : f32 to vector<2x128xf32>
    %28 = arith.minimumf %27, %26 : vector<2x128xf32>
    %29 = vector.broadcast %0 : f32 to vector<2x128xf32>
    %30 = arith.mulf %16, %29 : vector<2x128xf32>
    %cst_19 = arith.constant 0.000000e+00 : f32
    %cst_20 = arith.constant 1.000000e+00 : f32
    %31 = vector.broadcast %cst_19 : f32 to vector<2x128xf32>
    %32 = arith.maximumf %31, %30 : vector<2x128xf32>
    %33 = vector.broadcast %cst_20 : f32 to vector<2x128xf32>
    %34 = arith.minimumf %33, %32 : vector<2x128xf32>
    %35 = vector.broadcast %1 : f32 to vector<2x128xf32>
    %36 = arith.mulf %35, %22 : vector<2x128xf32>
    %37 = vector.broadcast %7 : f32 to vector<2x128xf32>
    %38 = arith.addf %36, %37 : vector<2x128xf32>
    %cst_21 = arith.constant 0.000000e+00 : f32
    %cst_22 = arith.constant 1.000000e+00 : f32
    %39 = vector.broadcast %cst_21 : f32 to vector<2x128xf32>
    %40 = arith.maximumf %39, %38 : vector<2x128xf32>
    %41 = vector.broadcast %cst_22 : f32 to vector<2x128xf32>
    %42 = arith.minimumf %41, %40 : vector<2x128xf32>
    %43 = vector.broadcast %1 : f32 to vector<2x128xf32>
    %44 = arith.mulf %43, %28 : vector<2x128xf32>
    %45 = vector.broadcast %7 : f32 to vector<2x128xf32>
    %46 = arith.addf %44, %45 : vector<2x128xf32>
    %cst_23 = arith.constant 0.000000e+00 : f32
    %cst_24 = arith.constant 1.000000e+00 : f32
    %47 = vector.broadcast %cst_23 : f32 to vector<2x128xf32>
    %48 = arith.maximumf %47, %46 : vector<2x128xf32>
    %49 = vector.broadcast %cst_24 : f32 to vector<2x128xf32>
    %50 = arith.minimumf %49, %48 : vector<2x128xf32>
    %51 = vector.broadcast %1 : f32 to vector<2x128xf32>
    %52 = arith.mulf %51, %34 : vector<2x128xf32>
    %53 = vector.broadcast %7 : f32 to vector<2x128xf32>
    %54 = arith.addf %52, %53 : vector<2x128xf32>
    %cst_25 = arith.constant 0.000000e+00 : f32
    %cst_26 = arith.constant 1.000000e+00 : f32
    %55 = vector.broadcast %cst_25 : f32 to vector<2x128xf32>
    %56 = arith.maximumf %55, %54 : vector<2x128xf32>
    %57 = vector.broadcast %cst_26 : f32 to vector<2x128xf32>
    %58 = arith.minimumf %57, %56 : vector<2x128xf32>
    %cst_27 = arith.constant 2.989000e-01 : f32
    %59 = vector.broadcast %cst_27 : f32 to vector<2x128xf32>
    %60 = arith.mulf %59, %42 : vector<2x128xf32>
    %cst_28 = arith.constant 5.870000e-01 : f32
    %61 = vector.broadcast %cst_28 : f32 to vector<2x128xf32>
    %62 = arith.mulf %61, %50 : vector<2x128xf32>
    %63 = arith.addf %60, %62 : vector<2x128xf32>
    %cst_29 = arith.constant 1.140000e-01 : f32
    %64 = vector.broadcast %cst_29 : f32 to vector<2x128xf32>
    %65 = arith.mulf %64, %58 : vector<2x128xf32>
    %66 = arith.addf %63, %65 : vector<2x128xf32>
    %67 = vector.broadcast %2 : f32 to vector<2x128xf32>
    %68 = arith.mulf %67, %42 : vector<2x128xf32>
    %69 = vector.broadcast %8 : f32 to vector<2x128xf32>
    %70 = arith.mulf %69, %66 : vector<2x128xf32>
    %71 = arith.addf %68, %70 : vector<2x128xf32>
    %cst_30 = arith.constant 0.000000e+00 : f32
    %cst_31 = arith.constant 1.000000e+00 : f32
    %72 = vector.broadcast %cst_30 : f32 to vector<2x128xf32>
    %73 = arith.maximumf %72, %71 : vector<2x128xf32>
    %74 = vector.broadcast %cst_31 : f32 to vector<2x128xf32>
    %75 = arith.minimumf %74, %73 : vector<2x128xf32>
    %76 = vector.broadcast %2 : f32 to vector<2x128xf32>
    %77 = arith.mulf %76, %50 : vector<2x128xf32>
    %78 = vector.broadcast %8 : f32 to vector<2x128xf32>
    %79 = arith.mulf %78, %66 : vector<2x128xf32>
    %80 = arith.addf %77, %79 : vector<2x128xf32>
    %cst_32 = arith.constant 0.000000e+00 : f32
    %cst_33 = arith.constant 1.000000e+00 : f32
    %81 = vector.broadcast %cst_32 : f32 to vector<2x128xf32>
    %82 = arith.maximumf %81, %80 : vector<2x128xf32>
    %83 = vector.broadcast %cst_33 : f32 to vector<2x128xf32>
    %84 = arith.minimumf %83, %82 : vector<2x128xf32>
    %85 = vector.broadcast %2 : f32 to vector<2x128xf32>
    %86 = arith.mulf %85, %58 : vector<2x128xf32>
    %87 = vector.broadcast %8 : f32 to vector<2x128xf32>
    %88 = arith.mulf %87, %66 : vector<2x128xf32>
    %89 = arith.addf %86, %88 : vector<2x128xf32>
    %cst_34 = arith.constant 0.000000e+00 : f32
    %cst_35 = arith.constant 1.000000e+00 : f32
    %90 = vector.broadcast %cst_34 : f32 to vector<2x128xf32>
    %91 = arith.maximumf %90, %89 : vector<2x128xf32>
    %92 = vector.broadcast %cst_35 : f32 to vector<2x128xf32>
    %93 = arith.minimumf %92, %91 : vector<2x128xf32>
    %94 = arith.maximumf %75, %84 : vector<2x128xf32>
    %95 = arith.maximumf %94, %93 : vector<2x128xf32>
    %96 = arith.minimumf %75, %84 : vector<2x128xf32>
    %97 = arith.minimumf %96, %93 : vector<2x128xf32>
    %98 = arith.subf %95, %97 : vector<2x128xf32>
    %cst_36 = arith.constant 9.99999996E-13 : f32
    %99 = vector.broadcast %cst_36 : f32 to vector<2x128xf32>
    %100 = arith.maximumf %95, %99 : vector<2x128xf32>
    %101 = tpu.reciprocal %100 {approx = true} : vector<2x128xf32> -> vector<2x128xf32>
    %cst_37 = arith.constant 9.99999996E-13 : f32
    %102 = vector.broadcast %cst_37 : f32 to vector<2x128xf32>
    %103 = arith.maximumf %98, %102 : vector<2x128xf32>
    %104 = tpu.reciprocal %103 {approx = true} : vector<2x128xf32> -> vector<2x128xf32>
    %105 = arith.mulf %98, %101 : vector<2x128xf32>
    %cst_38 = arith.constant 1.000000e+00 : f32
    %106 = vector.broadcast %cst_38 : f32 to vector<2x128xf32>
    %107 = arith.minimumf %105, %106 : vector<2x128xf32>
    %108 = arith.subf %95, %75 : vector<2x128xf32>
    %109 = arith.mulf %108, %104 : vector<2x128xf32>
    %110 = arith.subf %95, %84 : vector<2x128xf32>
    %111 = arith.mulf %110, %104 : vector<2x128xf32>
    %112 = arith.subf %95, %93 : vector<2x128xf32>
    %113 = arith.mulf %112, %104 : vector<2x128xf32>
    %114 = arith.cmpf oeq, %95, %75 : vector<2x128xf32>
    %115 = arith.subf %113, %111 : vector<2x128xf32>
    %116 = arith.cmpf oeq, %95, %84 : vector<2x128xf32>
    %cst_39 = arith.constant 2.000000e+00 : f32
    %117 = vector.broadcast %cst_39 : f32 to vector<2x128xf32>
    %118 = arith.addf %117, %109 : vector<2x128xf32>
    %119 = arith.subf %118, %113 : vector<2x128xf32>
    %cst_40 = arith.constant 4.000000e+00 : f32
    %120 = vector.broadcast %cst_40 : f32 to vector<2x128xf32>
    %121 = arith.addf %120, %111 : vector<2x128xf32>
    %122 = arith.subf %121, %109 : vector<2x128xf32>
    %123 = arith.select %116, %119, %122 : vector<2x128xi1>, vector<2x128xf32>
    %124 = arith.select %114, %115, %123 : vector<2x128xi1>, vector<2x128xf32>
    %125 = vector.broadcast %10 : f32 to vector<2x128xf32>
    %126 = arith.addf %124, %125 : vector<2x128xf32>
    %cst_41 = arith.constant 6.000000e+00 : f32
    %127 = vector.broadcast %cst_41 : f32 to vector<2x128xf32>
    %128 = arith.cmpf oge, %126, %127 : vector<2x128xf32>
    %cst_42 = arith.constant 1.200000e+01 : f32
    %129 = vector.broadcast %cst_42 : f32 to vector<2x128xf32>
    %130 = arith.cmpf oge, %126, %129 : vector<2x128xf32>
    %cst_43 = arith.constant 1.200000e+01 : f32
    %cst_44 = arith.constant 6.000000e+00 : f32
    %131 = vector.broadcast %cst_43 : f32 to vector<2x128xf32>
    %132 = vector.broadcast %cst_44 : f32 to vector<2x128xf32>
    %133 = arith.select %130, %131, %132 : vector<2x128xi1>, vector<2x128xf32>
    %cst_45 = arith.constant 0.000000e+00 : f32
    %134 = vector.broadcast %cst_45 : f32 to vector<2x128xf32>
    %135 = arith.select %128, %133, %134 : vector<2x128xi1>, vector<2x128xf32>
    %136 = arith.subf %126, %135 : vector<2x128xf32>
    %137 = math.floor %136 : vector<2x128xf32>
    %138 = arith.subf %136, %137 : vector<2x128xf32>
    %cst_46 = arith.constant 1.000000e+00 : f32
    %139 = vector.broadcast %cst_46 : f32 to vector<2x128xf32>
    %140 = arith.subf %139, %107 : vector<2x128xf32>
    %141 = arith.mulf %95, %140 : vector<2x128xf32>
    %142 = arith.mulf %107, %138 : vector<2x128xf32>
    %cst_47 = arith.constant 1.000000e+00 : f32
    %143 = vector.broadcast %cst_47 : f32 to vector<2x128xf32>
    %144 = arith.subf %143, %142 : vector<2x128xf32>
    %145 = arith.mulf %95, %144 : vector<2x128xf32>
    %cst_48 = arith.constant 1.000000e+00 : f32
    %146 = vector.broadcast %cst_48 : f32 to vector<2x128xf32>
    %147 = arith.subf %146, %138 : vector<2x128xf32>
    %148 = arith.mulf %107, %147 : vector<2x128xf32>
    %cst_49 = arith.constant 1.000000e+00 : f32
    %149 = vector.broadcast %cst_49 : f32 to vector<2x128xf32>
    %150 = arith.subf %149, %148 : vector<2x128xf32>
    %151 = arith.mulf %95, %150 : vector<2x128xf32>
    %cst_50 = arith.constant 0.000000e+00 : f32
    %152 = vector.broadcast %cst_50 : f32 to vector<2x128xf32>
    %153 = arith.cmpf oeq, %137, %152 : vector<2x128xf32>
    %cst_51 = arith.constant 1.000000e+00 : f32
    %154 = vector.broadcast %cst_51 : f32 to vector<2x128xf32>
    %155 = arith.cmpf oeq, %137, %154 : vector<2x128xf32>
    %cst_52 = arith.constant 2.000000e+00 : f32
    %156 = vector.broadcast %cst_52 : f32 to vector<2x128xf32>
    %157 = arith.cmpf oeq, %137, %156 : vector<2x128xf32>
    %cst_53 = arith.constant 3.000000e+00 : f32
    %158 = vector.broadcast %cst_53 : f32 to vector<2x128xf32>
    %159 = arith.cmpf oeq, %137, %158 : vector<2x128xf32>
    %cst_54 = arith.constant 4.000000e+00 : f32
    %160 = vector.broadcast %cst_54 : f32 to vector<2x128xf32>
    %161 = arith.cmpf oeq, %137, %160 : vector<2x128xf32>
    %162 = arith.select %153, %95, %95 : vector<2x128xi1>, vector<2x128xf32>
    %163 = arith.select %155, %145, %162 : vector<2x128xi1>, vector<2x128xf32>
    %164 = arith.select %157, %141, %163 : vector<2x128xi1>, vector<2x128xf32>
    %165 = arith.select %159, %141, %164 : vector<2x128xi1>, vector<2x128xf32>
    %166 = arith.select %161, %151, %165 : vector<2x128xi1>, vector<2x128xf32>
    %c0_55 = arith.constant 0 : index
    %c0_56 = arith.constant 0 : index
    %c0_57 = arith.constant 0 : index
    %c0_58 = arith.constant 0 : index
    %167 = vector.load %arg5[%c0_55, %c0_56, %c0_57, %c0_58] : memref<1x3x2x128xf32, #tpu.memory_space<vmem>>, vector<1x1x2x128xf32>
    %168 = vector.shape_cast %167 : vector<1x1x2x128xf32> to vector<2x128xf32>
    %169 = vector.shape_cast %166 : vector<2x128xf32> to vector<1x1x2x128xf32>
    tpu.vector_store %arg5[%c0_55, %c0_56, %c0_57, %c0_58], %169 {strides = array<i32>} : memref<1x3x2x128xf32, #tpu.memory_space<vmem>>, vector<1x1x2x128xf32>,
    %170 = arith.select %153, %151, %141 : vector<2x128xi1>, vector<2x128xf32>
    %171 = arith.select %155, %95, %170 : vector<2x128xi1>, vector<2x128xf32>
    %172 = arith.select %157, %95, %171 : vector<2x128xi1>, vector<2x128xf32>
    %173 = arith.select %159, %145, %172 : vector<2x128xi1>, vector<2x128xf32>
    %174 = arith.select %161, %141, %173 : vector<2x128xi1>, vector<2x128xf32>
    %c0_59 = arith.constant 0 : index
    %c1_60 = arith.constant 1 : index
    %c0_61 = arith.constant 0 : index
    %c0_62 = arith.constant 0 : index
    %175 = vector.load %arg5[%c0_59, %c1_60, %c0_61, %c0_62] : memref<1x3x2x128xf32, #tpu.memory_space<vmem>>, vector<1x1x2x128xf32>
    %176 = vector.shape_cast %175 : vector<1x1x2x128xf32> to vector<2x128xf32>
    %177 = vector.shape_cast %174 : vector<2x128xf32> to vector<1x1x2x128xf32>
    tpu.vector_store %arg5[%c0_59, %c1_60, %c0_61, %c0_62], %177 {strides = array<i32>} : memref<1x3x2x128xf32, #tpu.memory_space<vmem>>, vector<1x1x2x128xf32>,
    %178 = arith.select %153, %141, %145 : vector<2x128xi1>, vector<2x128xf32>
    %179 = arith.select %155, %141, %178 : vector<2x128xi1>, vector<2x128xf32>
    %180 = arith.select %157, %151, %179 : vector<2x128xi1>, vector<2x128xf32>
    %181 = arith.select %159, %95, %180 : vector<2x128xi1>, vector<2x128xf32>
    %182 = arith.select %161, %95, %181 : vector<2x128xi1>, vector<2x128xf32>
    %c0_63 = arith.constant 0 : index
    %c2_64 = arith.constant 2 : index
    %c0_65 = arith.constant 0 : index
    %c0_66 = arith.constant 0 : index
    %183 = vector.load %arg5[%c0_63, %c2_64, %c0_65, %c0_66] : memref<1x3x2x128xf32, #tpu.memory_space<vmem>>, vector<1x1x2x128xf32>
    %184 = vector.shape_cast %183 : vector<1x1x2x128xf32> to vector<2x128xf32>
    %185 = vector.shape_cast %182 : vector<2x128xf32> to vector<1x1x2x128xf32>
    tpu.vector_store %arg5[%c0_63, %c2_64, %c0_65, %c0_66], %185 {strides = array<i32>} : memref<1x3x2x128xf32, #tpu.memory_space<vmem>>, vector<1x1x2x128xf32>,
    return
  }
  func.func @transform_0(%arg0: i32, %arg1: i32, %arg2: memref<4xf32, #tpu.memory_space<smem>>, %arg3: memref<2xf32, #tpu.memory_space<smem>>) -> (i32, i32, i32, i32) {
    %c0_i32 = arith.constant 0 : i32
    %c0_i32_0 = arith.constant 0 : i32
    %c0_i32_1 = arith.constant 0 : i32
    return %arg0, %c0_i32, %arg1, %c0_i32_0 : i32, i32, i32, i32
  }
  func.func @transform_1(%arg0: i32, %arg1: i32, %arg2: memref<4xf32, #tpu.memory_space<smem>>, %arg3: memref<2xf32, #tpu.memory_space<smem>>) -> (i32, i32, i32, i32) {
    %c0_i32 = arith.constant 0 : i32
    %c0_i32_0 = arith.constant 0 : i32
    %c0_i32_1 = arith.constant 0 : i32
    return %arg0, %c0_i32, %arg1, %c0_i32_0 : i32, i32, i32, i32
  }
}

</mosaic_0001>

<bundles_post_ra>
// kernel: tpu_custom_call.1
= control target key start
LH: loop header
LB: loop body
LE: loop exit
PB: predicated region body
PF: predicated region fallthrough
CT: control target
= control target key end

     0   :  { %s873_s0 = inlined_call_operand.hbm [shape: f32[4], index: 0, kind: input, shape index: {}]   ;;  %s874_s2 = inlined_call_operand.hbm [shape: f32[2,3,2,128], index: 2, kind: input, shape index: {}]   ;;  %s875_s3 = inlined_call_operand.hbm [shape: f32[2,3,2,128], index: 3, kind: output, shape index: {}]   ;;  %s876_s1 = inlined_call_operand.vmem [shape: f32[2], index: 1, kind: input, shape index: {}]  }
   0x1   :  { %s482_s14 = scalar_lea.hbm %s873_s0, 16 }
   0x2   :  { %p483_p0 = scmp.ne.s32.totalorder %s873_s0, %s482_s14  ;;  %p486_p1 = scmp.lt.u32.totalorder %s482_s14, %s873_s0 }
   0x4   :  { %p488_p2 = pnand %p486_p1, %p483_p0 }
   0x6   :  { %491 = shalt.err (!%p488_p2)  }
   0x7   :  { %s620_s19 = smov [#allocation3]   ;;  %s10_s24 = sshll.u32 %s876_s1, 4  ;;  %s11_s24 = int_to_ptr.vmem [resolvable:$true] %s10_s24 }
   0x8   :  { %9 = dma.hbm_to_smem %s873_s0, 16, %s620_s19, [#allocation2] }
   0x9   :  { %s492_s25 = scalar_lea.vmem %s11_s24, 16  ;;  %p497_p4 = scmp.lt.s32.totalorder %s11_s24, %s11_s24 }
   0xa   :  { %p493_p3 = scmp.ne.s32.totalorder %s11_s24, %s492_s25  ;;  %p498_p5 = scmp.lt.s32.totalorder %s492_s25, %s492_s25 }
   0xc   :  { %p499_p6 = por %p498_p5, %p497_p4 }
   0xe   :  { %p500_p7 = pnand %p499_p6, %p493_p3 }
  0x10   :  { %503 = shalt.err (!%p500_p7)  }
  0x11   :  { %s621_s26 = smov [#allocation4]  }
  0x12   :  { %13 = dma.vmem_to_smem %s11_s24, 16, %s621_s26, [#allocation2] }
  0x13   :  { %586 = dma.done.wait [#allocation2], 32 }
  0x14   :  { %587 = vsyncadd [#allocation2], 4294967264 }
  0x15   :  { %15 = sfence }
  0x16   :  { %16 = vsyncpa [#allocation6], 0 }
  0x17   :  { %18 = vsyncpa [#allocation6 + $0x1], 0 }
  0x18   :  { %19 = vsyncpa [#allocation7], 0 }
  0x19   :  { %21 = vsyncpa [#allocation7 + $0x1], 0  ;;  %s664_s0 = smov 0   ;;  %s666_s1 = smov 0  }
  0x1a   :  { %s668_s27 = smov 0   ;;  %s670_s28 = smov 0  }
  0x1b   :  { %s672_s29 = smov 0   ;;  %s674_s30 = smov 0  }
  0x1c LB: > { %s389_s4 = sadd.s32 4294967295, %s618_s30   ;;  %s390_s5 = sadd.s32 4294967294, %s618_s30   ;;  %s618_s30 = sphi %s674_s30, %s27_s30   ;;  %s614_s29 = sphi %s672_s29, %s891_s29   ;;  %s610_s28 = sphi %s670_s28, %s890_s28   ;;  %s606_s27 = sphi %s668_s27, %s889_s27   ;;  %s602_s1 = sphi %s666_s1, %s888_s1   ;;  %s598_s0 = sphi %s664_s0, %s887_s0  }
  0x1d   : > { %s39_s6 = sadd.s32 1, %s614_s29  ;;  %s48_s7 = sadd.s32 1, %s606_s27 }
  0x1e   : > { %p41_p8 = scmp.ge.s32.totalorder %s39_s6, 2  ;;  %p55_p9 = scmp.ne.s32.totalorder %s606_s27, %s602_s1 }
  0x1f   : > { %p56_p10 = scmp.eq.s32.totalorder %s618_s30, 0  ;;  %p61_p11 = scmp.ne.s32.totalorder %s602_s1, %s598_s0 }
  0x20   : > { %s893_s6 = smov (%p41_p8, %s39_s6), 0  ;;  %p62_p13 = scmp.eq.s32.totalorder %s389_s4, 0 }
  0x21   : > { %p705_p12 = por %p56_p10, %p55_p9  ;;  %s43_s9 = ssub.s32 %s614_s29, %s893_s6 }
  0x22   : > { %p87_p0 = scmp.eq.s32.totalorder %s389_s4, 1  ;;  %p46_p1 = scmp.eq.s32.totalorder %s43_s9, 0 }
  0x23   : > { %p711_p2 = por %p62_p13, %p61_p11  ;;  %p93_p4 = scmp.eq.s32.totalorder %s390_s5, 1 }
  0x24   : > { %p715_p3 = por %p87_p0, %p55_p9  ;;  %p421_p7 = scmp.lt.s32.totalorder %s618_s30, 2 }
  0x25   : > { %s720_s12 = scalar_select %p46_p1, %s606_s27, %s48_s7  }
  0x26   : > { %s880_s11 = scalar_select %p715_p3, 1, 0 }
  0x27   : > { %p722_p5 = por %p93_p4, %p61_p11  ;;  %s113_s14 = sand.u32 1, %s606_s27  }
  0x28   : > { %s405_s15 = smul.u32 6, %s113_s14  ;;  %p732_p8 = pnand %p421_p7, %p705_p12 }
  0x29   : > { %s881_s13 = scalar_select %p722_p5, 1, 0 }
  0x2a   : > { %s406_s16 = smul.u32 96, %s614_s29  ;;  %s117_s21 = scalar_lea.vmem [#allocation5], %s405_s15 }
  0x2b   : > { %s125_s22 = sshll.u32 %s117_s21, 4  ;;  %s744_s23 = scalar_lea.sflag [#allocation6], %s113_s14  ;;  %s741_s22 = int_to_ptr.vmem [resolvable:$true] %s125_s22 }
  0x2c   : > { %s739_s20 = scalar_lea.hbm %s874_s2, %s406_s16  ;;  %p506_p11 = pneg %p732_p8 }
  0x2d   : > { %s504_s24 = scalar_lea.hbm %s739_s20, 96  ;;  %s509_s4 = scalar_lea.hbm %s874_s2, 192 }
  0x2e   : > { %p505_p10 = scmp.ne.s32.totalorder %s739_s20, %s504_s24  ;;  %p510_p0 = scmp.lt.u32.totalorder %s739_s20, %s874_s2 }
  0x2f   : > { %p511_p1 = scmp.lt.u32.totalorder %s509_s4, %s504_s24  ;;  %p513_p7 = scmp.lt.u32.totalorder %s504_s24, %s739_s20 }
  0x30   : > { %p507_p12 = pnand %p506_p11, %p505_p10 }
  0x31   : > { %p512_p4 = por %p511_p1, %p510_p0 }
  0x32   : > { %p508_p13 = pneg %p507_p12 }
  0x33   : > { %p514_p6 = por %p513_p7, %p512_p4 }
  0x35   : > { %p515_p9 = pnand %p514_p6, %p508_p13 }
  0x37   : > { %518 = shalt.err (!%p515_p9)
}
  0x38   : > { %s519_s8 = scalar_lea.vmem %s741_s22, 96  ;;  %s622_s9 = smov [#allocation5]  }
  0x39   : > { %p520_p10 = scmp.ne.s32.totalorder %s741_s22, %s519_s8  ;;  %s524_s14 = sshll.u32 %s622_s9, 4  ;;  %s525_s14 = int_to_ptr.vmem [resolvable:$false] %s524_s14 }
  0x3a   : > { %s526_s15 = scalar_lea.vmem %s525_s14, 192  ;;  %p527_p3 = scmp.lt.s32.totalorder %s741_s22, %s525_s14 }
  0x3b   : > { %p522_p12 = pnand %p520_p10, %p506_p11  ;;  %p528_p0 = scmp.lt.s32.totalorder %s526_s15, %s519_s8 }
  0x3d   : > { %p523_p5 = pneg %p522_p12  ;;  %p529_p1 = por %p528_p0, %p527_p3 }
  0x3f   : > { %p530_p4 = pnand %p529_p1, %p523_p5 }
  0x41   : > { %533 = shalt.err (!%p530_p4)
}
  0x42   : > { %s623_s16 = smov 32   ;;  %s624_s18 = smov 2  }
  0x43   : > { %416 = dma.hbm_to_vmem [thread:$0]  (!%p732_p8), %s739_s20, 96, %s741_s22, %s744_s23, %s623_s16, %s623_s16, %s624_s18  }
  0x44   : > { %p133_p6 = scmp.lt.s32.totalorder %s618_s30, 3  ;;  %p883_p9 = scmp.ge.s32.totalorder %s618_s30, 1 }
  0x46   : > { %p134_p11 = pnand %p883_p9, %p133_p6 }
  0x47   : > { %s776_s19 = sand.u32 (!%p134_p11), 1, %s602_s1  }
  0x48   : > { %137 = sbr.rel (%p134_p11) target bundleno = 181 (0xb5), region = 24  ;;  %s140_s24 = scalar_lea.sflag (!%p134_p11), [#allocation6], %s776_s19 }
  0x49   : > { %s407_s21 = smul.u32 (!%p134_p11), 6, %s776_s19 }
  0x4b   : > { %s143_s25 = scalar_lea.vmem (!%p134_p11), [#allocation5], %s407_s21 }
  0x4f   : > { %589 = dma.done.wait (%p711_p2), %s140_s24, 96  }
  0x50   : > { %591 = vsyncadd (%p711_p2), %s140_s24, 4294967200  ;;  %s162_s17 = sld [smem:[#allocation3]]  ;;  %s395_s20 = sld [smem:[#allocation3 + $0x1]]  ;;  %v172_v0 = vld [vmem:[%s143_s25] sm:$0x3] }
  0x51   : > { %s166_s22 = sld [smem:[#allocation4 + %s610_s28]]  ;;  %v398_v1 = vld [vmem:[%s143_s25 + $0x2] sm:$0x3]  ;;  %v399_v3 = vld [vmem:[%s143_s25 + $0x4] sm:$0x3]  ;;  %s161_s9 = scalar_lea.vmem [#allocation8], %s407_s21 }
  0x52   : > { %s396_s10 = sld [smem:[#allocation3 + $0x2]]  ;;  %s397_s5 = sld [smem:[#allocation3 + $0x3]] }
  0x53   : > { %s304_s14 = sshll.u32 %s161_s9, 4  ;;  %s408_s15 = smul.u32 96, %s610_s28  ;;  %s813_s14 = int_to_ptr.vmem [resolvable:$true] %s304_s14 }
  0x54   : > { %s290_s21 = scalar_lea.sflag [#allocation7], %s776_s19  ;;  %s534_s24 = scalar_lea.vmem %s813_s14, 96 }
  0x55   : > { %s823_s18 = scalar_lea.hbm %s875_s3, %s408_s15  ;;  %p535_p2 = scmp.ne.s32.totalorder %s813_s14, %s534_s24 }
  0x56   : > { %s167_s23 = ssub.f32 1.0, %s395_s20  ;;  %v177_v2 = vstv %s162_s17  ;;  %v187_v10 = vstv %s395_s20  ;;  %p884_p3 = scmp.ne.s32.totalorder %s880_s11, 0 }
  0x57   : > { %v178_v4 = vmul.f32 %v177_v2, %v172_v0  ;;  %v181_v5 = vmul.f32 %v398_v1, %v177_v2  ;;  %v184_v6 = vmul.f32 %v399_v3, %v177_v2  ;;  %s626_s25 = smov [#allocation8]  }
  0x58   : > { %s168_s26 = smul.f32 %s167_s23, %s166_s22  ;;  %s169_s4 = ssub.f32 1.0, %s396_s10  ;;  %v206_v30 = vstv %s396_s10 }
  0x59   : > { %v179_v7 = vmax.f32 %v178_v4, 0.0  ;;  %v182_v8 = vmax.f32 %v181_v5, 0.0  ;;  %v185_v9 = vmax.f32 %v184_v6, 0.0  ;;  %s170_s7 = smul.f32 6.0, %s397_s5  ;;  %p536_p5 = pnand %p535_p2, %p884_p3 }
  0x5a   : > { %v189_v14 = vstv %s168_s26  ;;  %v208_v32 = vstv %s169_s4  ;;  %s538_s17 = sshll.u32 %s626_s25, 4  ;;  %s539_s17 = int_to_ptr.vmem [resolvable:$false] %s538_s17 }
  0x5b   : > { %v180_v11 = vmin.f32 %v179_v7, 1.0  ;;  %v183_v12 = vmin.f32 %v182_v8, 1.0  ;;  %v186_v13 = vmin.f32 %v185_v9, 1.0  ;;  %s171_s8 = sadd.f32 6.0, %s170_s7  ;;  %v625_v8 = vmov 6.0   ;;  %p537_p8 = pneg %p536_p5 }
  0x5c   : > { %s540_s20 = scalar_lea.vmem %s539_s17, 192  ;;  %p541_p13 = scmp.lt.s32.totalorder %s813_s14, %s539_s17 }
  0x5d   : > { %v188_v15 = vmul.f32 %v187_v10, %v180_v11  ;;  %v193_v16 = vmul.f32 %v187_v10, %v183_v12  ;;  %v197_v17 = vmul.f32 %v187_v10, %v186_v13  ;;  %v247_v2 = vstv %s171_s8  ;;  %p542_p7 = scmp.lt.s32.totalorder %s540_s20, %s534_s24 }
  0x5f   : > { %v190_v18 = vadd.f32 %v189_v14, %v188_v15  ;;  %v194_v19 = vadd.f32 %v193_v16, %v189_v14  ;;  %v198_v20 = vadd.f32 %v197_v17, %v189_v14  ;;  %p543_p10 = por %p542_p7, %p541_p13 }
  0x61   : > { %v191_v21 = vmax.f32 %v190_v18, 0.0  ;;  %v195_v22 = vmax.f32 %v194_v19, 0.0  ;;  %v199_v23 = vmax.f32 %v198_v20, 0.0  ;;  %p544_p12 = pnand %p543_p10, %p537_p8 }
  0x63   : > { %v192_v24 = vmin.f32 %v191_v21, 1.0  ;;  %v196_v25 = vmin.f32 %v195_v22, 1.0  ;;  %v200_v26 = vmin.f32 %v199_v23, 1.0 }
  0x65   : > { %v201_v27 = vmul.f32 0.2989, %v192_v24  ;;  %v202_v28 = vmul.f32 0.587, %v196_v25  ;;  %v204_v29 = vmul.f32 0.114, %v200_v26  ;;  %v207_v34 = vmul.f32 %v206_v30, %v192_v24 }
  0x66   : > { %v213_v35 = vmul.f32 %v206_v30, %v196_v25  ;;  %v217_v36 = vmul.f32 %v206_v30, %v200_v26 }
  0x67   : > { %v203_v31 = vadd.f32 %v202_v28, %v201_v27 }
  0x69   : > { %v205_v33 = vadd.f32 %v204_v29, %v203_v31 }
  0x6b   : > { %v209_v37 = vmul.f32 %v208_v32, %v205_v33 }
  0x6d   : > { %v210_v38 = vadd.f32 %v209_v37, %v207_v34  ;;  %v214_v39 = vadd.f32 %v213_v35, %v209_v37  ;;  %v218_v40 = vadd.f32 %v217_v36, %v209_v37 }
  0x6f   : > { %v211_v41 = vmax.f32 %v210_v38, 0.0  ;;  %v215_v42 = vmax.f32 %v214_v39, 0.0  ;;  %v219_v43 = vmax.f32 %v218_v40, 0.0 }
  0x71   : > { %v212_v44 = vmin.f32 %v211_v41, 1.0  ;;  %v216_v45 = vmin.f32 %v215_v42, 1.0  ;;  %v220_v46 = vmin.f32 %v219_v43, 1.0 }
  0x73   : > { %v221_v47 = vmax.f32 %v212_v44, %v216_v45  ;;  %v223_v48 = vmin.f32 %v212_v44, %v216_v45 }
  0x75   : > { %v787_v49 = vmax.f32 %v221_v47, %v220_v46  ;;  %v224_v50 = vmin.f32 %v223_v48, %v220_v46 }
  0x77   : > { %v225_v51 = vsub.f32 %v787_v49, %v224_v50  ;;  %v226_v53 = vmax.f32 %v787_v49, 1e-12  ;;  %v232_v54 = vsub.f32 %v787_v49, %v212_v44  ;;  %v234_v55 = vsub.f32 %v787_v49, %v216_v45 }
  0x78   : > { %v236_v56 = vsub.f32 %v787_v49, %v220_v46  ;;  %vm240_vm0 = vcmp.eq.f32.partialorder %v787_v49, %v216_v45  ;;  %vm238_vm1 = vcmp.eq.f32.partialorder %v787_v49, %v212_v44 }
  0x79   : > { %v228_v52 = vmax.f32 %v225_v51, 1e-12 }
  0x7b   : > { %478 = vrcp.f32 %v228_v52 }
  0x7c   : > { %480 = vrcp.f32 %v226_v53 }
  0x85   : > { %v479_v57 = vpop.eup %478 }
  0x86   : > { %v233_v58 = vmul.f32 %v479_v57, %v232_v54  ;;  %v235_v59 = vmul.f32 %v479_v57, %v234_v55  ;;  %v237_v60 = vmul.f32 %v479_v57, %v236_v56  ;;  %v481_v5 = vpop.eup %480 }
  0x87   : > { %v230_v7 = vmul.f32 %v481_v5, %v225_v51 }
  0x88   : > { %v241_v61 = vadd.f32 2.0, %v233_v58  ;;  %v243_v62 = vadd.f32 4.0, %v235_v59  ;;  %v239_v63 = vsub.f32 %v237_v60, %v235_v59 }
  0x89   : > { %v231_v12 = vmin.f32 %v230_v7, 1.0 }
  0x8a   : > { %v242_v0 = vsub.f32 %v241_v61, %v237_v60  ;;  %v244_v1 = vsub.f32 %v243_v62, %v233_v58 }
  0x8b   : > { %v256_v15 = vsub.f32 1.0, %v231_v12 }
  0x8c   : > { %v245_v3 = vsel %vm240_vm0, %v242_v0, %v244_v1 }
  0x8d   : > { %v246_v4 = vsel %vm238_vm1, %v239_v63, %v245_v3  ;;  %v257_v18 = vmul.f32 %v256_v15, %v787_v49 }
  0x8e   : > { %v248_v6 = vadd.f32 %v247_v2, %v246_v4 }
  0x90   : > { %vm249_vm2 = vcmp.ge.f32.partialorder %v248_v6, 6.0  ;;  %vm250_vm3 = vcmp.ge.f32.partialorder %v248_v6, 12.0 }
  0x91   : > { %v251_v9 = vsel %vm250_vm3, 12.0, %v625_v8 }
  0x92   : > { %v252_v10 = vsel %vm249_vm2, %v251_v9, 0.0 }
  0x93   : > { %v253_v11 = vsub.f32 %v248_v6, %v252_v10 }
  0x95   : > { %v254_v13 = vfloor.f32 %v253_v11 }
  0x97   : > { %v255_v14 = vsub.f32 %v253_v11, %v254_v13  ;;  %vm266_vm4 = vcmp.eq.f32.partialorder %v254_v13, 1.0  ;;  %vm265_vm5 = vcmp.eq.f32.partialorder %v254_v13, 0.0  ;;  %vm267_vm6 = vcmp.eq.f32.partialorder %v254_v13, 2.0 }
  0x98   : > { %vm268_vm7 = vcmp.eq.f32.partialorder %v254_v13, 3.0  ;;  %vm269_vm8 = vcmp.eq.f32.partialorder %v254_v13, 4.0 }
  0x99   : > { %v258_v16 = vmul.f32 %v255_v14, %v231_v12  ;;  %v261_v17 = vsub.f32 1.0, %v255_v14 }
  0x9b   : > { %v259_v19 = vsub.f32 1.0, %v258_v16  ;;  %v262_v20 = vmul.f32 %v261_v17, %v231_v12 }
  0x9d   : > { %v260_v21 = vmul.f32 %v259_v19, %v787_v49  ;;  %v263_v22 = vsub.f32 1.0, %v262_v20 }
  0x9f   : > { %v264_v23 = vmul.f32 %v263_v22, %v787_v49  ;;  %v270_v24 = vsel %vm266_vm4, %v260_v21, %v787_v49  ;;  %v282_v25 = vsel %vm265_vm5, %v257_v18, %v260_v21 }
  0xa0   : > { %v271_v26 = vsel %vm267_vm6, %v257_v18, %v270_v24  ;;  %v283_v27 = vsel %vm266_vm4, %v257_v18, %v282_v25 }
  0xa1   : > { %v272_v28 = vsel %vm268_vm7, %v257_v18, %v271_v26  ;;  %v275_v29 = vsel %vm265_vm5, %v264_v23, %v257_v18  ;;  %v284_v30 = vsel %vm267_vm6, %v264_v23, %v283_v27 }
  0xa2   : > { %v273_v31 = vsel %vm269_vm8, %v264_v23, %v272_v28  ;;  %v276_v32 = vsel %vm266_vm4, %v787_v49, %v275_v29  ;;  %v285_v33 = vsel %vm268_vm7, %v787_v49, %v284_v30 }
  0xa3   : > { %274 = vst [vmem:[%s161_s9] sm:$0x3] %v273_v31  ;;  %v277_v34 = vsel %vm267_vm6, %v787_v49, %v276_v32  ;;  %v286_v35 = vsel %vm269_vm8, %v787_v49, %v285_v33 }
  0xa4   : > { %v278_v36 = vsel %vm268_vm7, %v260_v21, %v277_v34  ;;  %401 = vst [vmem:[%s161_s9 + $0x4] sm:$0x3] %v286_v35 }
  0xa5   : > { %v279_v37 = vsel %vm269_vm8, %v257_v18, %v278_v36 }
  0xa6   : > { %400 = vst [vmem:[%s161_s9 + $0x2] sm:$0x3] %v279_v37 }
  0xa7   : > { %547 = shalt.err (!%p544_p12)
}
  0xa8   : > { %s548_s22 = scalar_lea.hbm %s823_s18, 96  ;;  %s552_s10 = scalar_lea.hbm %s875_s3, 192 }
  0xa9   : > { %p549_p0 = scmp.ne.s32.totalorder %s823_s18, %s548_s22  ;;  %p553_p6 = scmp.lt.u32.totalorder %s823_s18, %s875_s3 }
  0xaa   : > { %p554_p9 = scmp.lt.u32.totalorder %s552_s10, %s548_s22  ;;  %p556_p2 = scmp.lt.u32.totalorder %s548_s22, %s823_s18 }
  0xab   : > { %p550_p1 = pnand %p549_p0, %p884_p3 }
  0xac   : > { %p555_p11 = por %p554_p9, %p553_p6 }
  0xad   : > { %p551_p4 = pneg %p550_p1 }
  0xae   : > { %p557_p5 = por %p556_p2, %p555_p11 }
  0xb0   : > { %p558_p8 = pnand %p557_p5, %p551_p4 }
  0xb2   : > { %561 = shalt.err (!%p558_p8)
}
  0xb3   : > { %s627_s7 = smov 32   ;;  %s628_s8 = smov 2  }
  0xb4   : > { %411 = dma.vmem_to_hbm [thread:$0]  (%p884_p3), %s813_s14, 96, %s823_s18, %s290_s21, %s627_s7, %s627_s7, %s628_s8  }
  0xb5 PF: > { %s319_s9 = sand.u32 1, %s598_s0   ;;  %p885_p13 = scmp.ne.s32.totalorder %s881_s13, 0 }
  0xb6   : > { %p886_p7 = scmp.ge.s32.totalorder %s618_s30, 2  ;;  %s320_s15 = scalar_lea.sflag [#allocation7], %s319_s9 }
  0xb8   : > { %p418_p10 = pnand %p886_p7, %p885_p13 }
  0xba   : > { %593 = dma.done.wait (!%p418_p10), %s320_s15, 96  }
  0xbb   : > { %595 = vsyncadd (!%p418_p10), %s320_s15, 4294967200  ;;  %s27_s30 = sadd.s32 1, %s618_s30   ;;  %s887_s0 = smov %s602_s1 }
  0xbc   : > { %p24_p12 = scmp.ge.s32.totalorder %s27_s30, 4   ;;  %s888_s1 = smov %s606_s27 }
  0xbd   : > { %s889_s27 = smov %s720_s12  ;;  %s890_s28 = smov %s614_s29 }
  0xbe   : > { %s891_s29 = smov %s893_s6  ;;  %26 = sbr.rel (!%p24_p12) target bundleno = 28 (0x1c), region = 73 }
  0xc5   :  { %325 = vsyncpa [#allocation6], 1 }
  0xc6   :  { %327 = vsyncpa [#allocation6 + $0x1], 1 }
  0xc7   :  { %328 = vsyncpa [#allocation7], 1 }
  0xc8   :  { %330 = vsyncpa [#allocation7 + $0x1], 1 }

</bundles_post_ra>
